<compile_context>
chip_gen: v6e
topology: v6e:2x2x1
jax: 0.10.0
libtpu: 0.0.40
codegen_flags: <defaults>
</compile_context>

<pallas_src>
import jax
import jax.numpy as jnp
from jax.experimental import pallas as pl
from jax.experimental.pallas import tpu as pltpu


def _bn_relu_kernel(x_ref, scale_ref, bias_ref, o_ref):
    # x_ref / o_ref : (tile_r, tile_c) tiles of the 2-D slab.
    # scale_ref / bias_ref : (tile_r, 1) or (1, tile_c) f32 params; either
    # broadcasts against the x tile.
    y = x_ref[...].astype(jnp.float32) * scale_ref[...] + bias_ref[...]
    o_ref[...] = jnp.maximum(y, 0.0).astype(o_ref.dtype)


def _round_up(a, m):
    return ((a + m - 1) // m) * m


def _sublane_multiple(dtype):
    # f32 -> 8, bf16/f16 -> 16, int8/fp8 -> 32 (sublane packing granularity).
    return max(8, 32 // max(1, jnp.dtype(dtype).itemsize))


def _vmem_budget():
    """Return (max_block_bytes, vmem_limit_bytes) per TPU generation."""
    try:
        vmem_cap = pltpu.get_tpu_info().vmem_capacity_bytes
    except Exception:
        vmem_cap = 64 * 1024 * 1024  # conservative fallback (safe on v7x)
    if vmem_cap >= 96 * 1024 * 1024:        # v5e / v6e: 128 MiB VMEM
        return 16 * 1024 * 1024, 96 * 1024 * 1024
    else:                                    # v7x: 64 MiB VMEM per TC
        return 8 * 1024 * 1024, 48 * 1024 * 1024


def _fused_bn_relu_2d(x2, scale_vec, bias_vec, params_on_rows, out_dtype,
                      max_block_bytes, vmem_limit, donate_x=False):
    rows, cols = x2.shape
    itemsize = jnp.dtype(x2.dtype).itemsize
    sub = _sublane_multiple(x2.dtype)
    lane_cap = 8192  # wide lane tiles -> long contiguous DMA rows

    # Lane (last) axis tiling: 128-multiples whenever possible; a full-extent
    # block is always legal for small / odd widths; large non-128-multiple
    # widths get a capped 128-multiple tile with edge clipping.
    if cols % 128 == 0:
        tile_c = min(cols, lane_cap)
    elif cols <= lane_cap:
        tile_c = cols
    else:
        tile_c = lane_cap

    # Sublane (row) axis tiling under the per-block VMEM budget.
    tr_budget = max(sub, (max_block_bytes // (tile_c * itemsize)) // sub * sub)
    tile_r = min(tr_budget, _round_up(rows, sub))
    if tile_r >= rows:
        tile_r = rows  # full-extent row block: always legal, no clipping

    n_i = pl.cdiv(rows, tile_r)
    n_j = pl.cdiv(cols, tile_c)

    if params_on_rows:
        p_shape, p_block = (rows, 1), (tile_r, 1)
    else:
        p_shape, p_block = (1, cols), (1, tile_c)
    scale2 = scale_vec.reshape(p_shape)
    bias2 = bias_vec.reshape(p_shape)

    if n_j == 1:
        # Collapse the degenerate column axis: one long parallel row axis.
        grid = (n_i,)
        x_map = lambda i: (i, 0)
        p_map = (lambda i: (i, 0)) if params_on_rows else (lambda i: (0, 0))
        dims = ("parallel",)
    else:
        grid = (n_i, n_j)
        x_map = lambda i, j: (i, j)
        p_map = (lambda i, j: (i, 0)) if params_on_rows else (lambda i, j: (0, j))
        dims = ("parallel", "parallel")

    kwargs = {}
    if donate_x:
        kwargs["input_output_aliases"] = {0: 0}

    return pl.pallas_call(
        _bn_relu_kernel,
        out_shape=jax.ShapeDtypeStruct((rows, cols), out_dtype),
        grid_spec=pltpu.PrefetchScalarGridSpec(
            num_scalar_prefetch=0,
            grid=grid,
            in_specs=[
                pl.BlockSpec((tile_r, tile_c), x_map),  # x tile
                pl.BlockSpec(p_block, p_map),           # scale
                pl.BlockSpec(p_block, p_map),           # bias
            ],
            out_specs=pl.BlockSpec((tile_r, tile_c), x_map),
        ),
        compiler_params=pltpu.CompilerParams(
            dimension_semantics=dims,
            vmem_limit_bytes=vmem_limit,
        ),
        cost_estimate=pl.CostEstimate(
            flops=3 * rows * cols,
            transcendentals=0,
            bytes_accessed=2 * rows * cols * itemsize,
        ),
        **kwargs,
    )(x2, scale2, bias2)


def post_activation(x, gamma, beta, running_mean, running_var, eps=1e-5,
                    donate_x=False):
    """BatchNorm2d (eval mode, running stats) + ReLU. x is NCHW, params (C,)."""
    N, C, H, W = x.shape
    out_dtype = x.dtype
    HW = H * W

    # Fold BN into per-channel scale/bias once in the wrapper (tiny (C,) ops).
    f32 = jnp.float32
    inv_std = jax.lax.rsqrt(running_var.astype(f32) + eps)
    scale = gamma.astype(f32) * inv_std                         # (C,)
    bias = beta.astype(f32) - running_mean.astype(f32) * scale  # (C,)

    max_block_bytes, vmem_limit = _vmem_budget()

    if HW % 128 == 0:
        # Path A: (N*C, H*W) slab, per-row (per-(n,c)) params; lane axis is
        # already a 128-multiple.
        x2 = x.reshape(N * C, HW)                      # free, contiguous merge
        scale_full = jnp.tile(scale, N)                # (N*C,)
        bias_full = jnp.tile(bias, N)
        params_on_rows = True
    else:
        # Path B: (N, C*H*W) slab, per-column params expanded once via repeat;
        # keeps the lane axis tileable in 128-multiples even when H*W < 128.
        x2 = x.reshape(N, C * HW)                      # free, contiguous merge
        scale_full = jnp.repeat(scale, HW)             # (C*H*W,)
        bias_full = jnp.repeat(bias, HW)
        params_on_rows = False

    out2 = _fused_bn_relu_2d(x2, scale_full, bias_full, params_on_rows,
                             out_dtype, max_block_bytes, vmem_limit,
                             donate_x=donate_x)
    return out2.reshape(N, C, H, W)


def _reference(x, gamma, beta, mean, var, eps=1e-5):
    g = gamma.reshape(1, -1, 1, 1)
    b = beta.reshape(1, -1, 1, 1)
    m = mean.reshape(1, -1, 1, 1)
    v = var.reshape(1, -1, 1, 1)
    y = (x - m) / jnp.sqrt(v + eps) * g + b
    return jnp.maximum(y, 0.0)


def _run_case(key, N, C, H, W):
    k_x, k_g, k_b, k_m, k_v = jax.random.split(key, 5)
    x = jax.random.normal(k_x, (N, C, H, W), dtype=jnp.float32)
    gamma = jax.random.normal(k_g, (C,), dtype=jnp.float32) * 0.5 + 1.0
    beta = jax.random.normal(k_b, (C,), dtype=jnp.float32) * 0.1
    mean = jax.random.normal(k_m, (C,), dtype=jnp.float32) * 0.2
    var = jax.random.uniform(k_v, (C,), dtype=jnp.float32, minval=0.5, maxval=1.5)

    out = post_activation(x, gamma, beta, mean, var)
    out = jax.block_until_ready(out)

    ref = _reference(x, gamma, beta, mean, var)
    assert out.shape == (N, C, H, W)
    assert jnp.allclose(out, ref, atol=1e-5, rtol=1e-5), "mismatch vs reference"


if __name__ == "__main__":
    key = jax.random.PRNGKey(0)
    k1, k2 = jax.random.split(key)

    # Path A: H*W multiple of 128 -> (N*C, H*W) slab.
    _run_case(k1, 2, 4, 16, 16)
    # Path B: DenseNet-final-block style H*W=49 -> (N, C*H*W) lane-dense slab.
    _run_case(k2, 2, 8, 7, 7)

    print("KERNEL_OK")
</pallas_src>

<mosaic_0001>
module attributes {stable_mosaic.version = 11 : i64} {
  func.func @_bn_relu_kernel(%arg0: i32, %arg1: memref<8x256xf32, #tpu.memory_space<vmem>>, %arg2: memref<8x1xf32, #tpu.memory_space<vmem>>, %arg3: memref<8x1xf32, #tpu.memory_space<vmem>>, %arg4: memref<8x256xf32, #tpu.memory_space<vmem>>) attributes {dimension_semantics = [#tpu.dimension_semantics<parallel>], iteration_bounds = array<i64: 1>, scalar_prefetch = 0 : i64, scratch_operands = 0 : i64, tpu.core_type = #tpu.core_type<tc>, window_params = [{transform_indices = @transform_0, window_bounds = array<i64: 8, 256>}, {transform_indices = @transform_1, window_bounds = array<i64: 8, 1>}, {transform_indices = @transform_2, window_bounds = array<i64: 8, 1>}, {transform_indices = @transform_3, window_bounds = array<i64: 8, 256>}]} {
    %c0 = arith.constant 0 : index
    %c0_0 = arith.constant 0 : index
    %0 = vector.load %arg1[%c0, %c0_0] : memref<8x256xf32, #tpu.memory_space<vmem>>, vector<8x256xf32>
    %c0_1 = arith.constant 0 : index
    %c0_2 = arith.constant 0 : index
    %1 = vector.load %arg2[%c0_1, %c0_2] : memref<8x1xf32, #tpu.memory_space<vmem>>, vector<8x1xf32>
    %2 = vector.broadcast %1 : vector<8x1xf32> to vector<8x256xf32>
    %3 = arith.mulf %0, %2 : vector<8x256xf32>
    %c0_3 = arith.constant 0 : index
    %c0_4 = arith.constant 0 : index
    %4 = vector.load %arg3[%c0_3, %c0_4] : memref<8x1xf32, #tpu.memory_space<vmem>>, vector<8x1xf32>
    %5 = vector.broadcast %4 : vector<8x1xf32> to vector<8x256xf32>
    %6 = arith.addf %3, %5 : vector<8x256xf32>
    %cst = arith.constant 0.000000e+00 : f32
    %7 = vector.broadcast %cst : f32 to vector<8x256xf32>
    %8 = arith.maximumf %6, %7 : vector<8x256xf32>
    %c0_5 = arith.constant 0 : index
    %c0_6 = arith.constant 0 : index
    %9 = vector.load %arg4[%c0_5, %c0_6] : memref<8x256xf32, #tpu.memory_space<vmem>>, vector<8x256xf32>
    tpu.vector_store %arg4[%c0_5, %c0_6], %8 {strides = array<i32>} : memref<8x256xf32, #tpu.memory_space<vmem>>, vector<8x256xf32>,
    return
  }
  func.func @transform_0(%arg0: i32) -> (i32, i32) {
    %c0_i32 = arith.constant 0 : i32
    %c0_i32_0 = arith.constant 0 : i32
    return %arg0, %c0_i32 : i32, i32
  }
  func.func @transform_1(%arg0: i32) -> (i32, i32) {
    %c0_i32 = arith.constant 0 : i32
    %c0_i32_0 = arith.constant 0 : i32
    return %arg0, %c0_i32 : i32, i32
  }
  func.func @transform_2(%arg0: i32) -> (i32, i32) {
    %c0_i32 = arith.constant 0 : i32
    %c0_i32_0 = arith.constant 0 : i32
    return %arg0, %c0_i32 : i32, i32
  }
  func.func @transform_3(%arg0: i32) -> (i32, i32) {
    %c0_i32 = arith.constant 0 : i32
    %c0_i32_0 = arith.constant 0 : i32
    return %arg0, %c0_i32 : i32, i32
  }
}

</mosaic_0001>

<bundles_post_ra>
// kernel: tpu_custom_call.1
= control target key start
LH: loop header
LB: loop body
LE: loop exit
PB: predicated region body
PF: predicated region fallthrough
CT: control target
= control target key end

     0   :  { %v76_v1 = vmov 0   ;;  %s113_s0 = inlined_call_operand.vmem [shape: f32[8,256], index: 0, kind: input, shape index: {}]   ;;  %s114_s1 = inlined_call_operand.vmem [shape: f32[8,1], index: 1, kind: input, shape index: {}]   ;;  %s115_s2 = inlined_call_operand.vmem [shape: f32[8,1], index: 2, kind: input, shape index: {}]   ;;  %s116_s3 = inlined_call_operand.hbm [shape: f32[8,256], index: 3, kind: output, shape index: {}]  }
   0x1   :  { %v17_v0 = vld [vmem:[%s114_s1] sm:$0xff]  ;;  %53 = vset.pattern.permute.xlu0 %v76_v1 }
   0x2   :  { %8 = vsyncpa [#allocation3], 0  ;;  %20 = vperm.xlu0 %53, %v17_v0   ;;  %v25_v2 = vld [vmem:[%s115_s2] sm:$0xff]  ;;  %v16_v5 = vld [vmem:[%s113_s0 + $0x8] sm:$0xff]  ;;  %s77_s1 = smov [#allocation2]  }
   0x3   :  { %v15_v4 = vld [vmem:[%s113_s0] sm:$0xff]  ;;  %s43_s20 = sshll.u32 %s77_s1, 4  ;;  %s44_s20 = int_to_ptr.vmem [resolvable:$true] %s43_s20 }
   0x4   :  { %s54_s2 = scalar_lea.vmem %s44_s20, 256  ;;  %p59_p1 = scmp.lt.s32.totalorder %s44_s20, %s44_s20 }
   0x5   :  { %p55_p0 = scmp.ne.s32.totalorder %s44_s20, %s54_s2  ;;  %p60_p2 = scmp.lt.s32.totalorder %s54_s2, %s54_s2 }
   0x6   :  { %28 = vperm.xlu0 %53, %v25_v2  }
   0x7   :  { %p61_p3 = por %p60_p2, %p59_p1 }
   0x9   :  { %p62_p4 = pnand %p61_p3, %p55_p0 }
  0x7d   :  { %v21_v3 = vpop.permute.xlu0 %20 }
  0x7e   :  { %v23_v6 = vmul.f32 %v21_v3, %v15_v4  ;;  %v24_v7 = vmul.f32 %v21_v3, %v16_v5 }
  0x81   :  { %v29_v8 = vpop.permute.xlu0 %28 }
  0x82   :  { %v31_v9 = vadd.f32 %v29_v8, %v23_v6  ;;  %v32_v10 = vadd.f32 %v29_v8, %v24_v7 }
  0x84   :  { %v33_v11 = vmax.f32 %v31_v9, 0.0  ;;  %v34_v12 = vmax.f32 %v32_v10, 0.0 }
  0x86   :  { %35 = vst [vmem:[#allocation2] sm:$0xff] %v33_v11  ;;  %36 = vst [vmem:[#allocation2 + $0x8] sm:$0xff] %v34_v12 }
  0x87   :  { %65 = shalt.err (!%p62_p4)
}
  0x88   :  { %46 = dma.vmem_to_hbm [thread:$0]  %s44_s20, 256, %s116_s3, [#allocation3]  }
  0x89   :  { %74 = dma.done.wait [#allocation3], 256  }
  0x8a   :  { %75 = vsyncadd [#allocation3], 4294967040 }
  0x8b   :  { %50 = vsyncpa [#allocation3], 1 }

</bundles_post_ra>
